<compile_context>
chip_gen: v5e
topology: v5e:2x2
jax: 0.10.0
libtpu: 0.0.40
codegen_flags: <defaults>
</compile_context>

<pallas_src>
import jax
import jax.numpy as jnp
from jax.experimental import pallas as pl
from jax.experimental.pallas import tpu as pltpu

_MiB = 1024 * 1024
# >= 3 blocks per v7x TensorCore (the single grid axis is "parallel", so it is
# sharded across the two TCs) — keeps each core's double-buffer pipeline full.
_MIN_GRID_STEPS = 6
# ...but don't bother splitting once blocks would drop below this size.
_MIN_SPLIT_BLOCK_BYTES = 512 * 1024


def _plus_const_kernel(x_ref, const_ref, o_ref):
    # const lives in SMEM (one sld + splat); the add is a whole-tile VPU op.
    c = const_ref[0, 0].astype(o_ref.dtype)
    o_ref[...] = x_ref[...] + c


def _block_budget():
    """Generation-dependent (block_bytes, vmem_limit_bytes).

    VMEM need is ~4x block (input + output, each double-buffered)."""
    try:
        vmem_phys = pltpu.get_tpu_info().vmem_capacity_bytes
    except Exception:
        vmem_phys = 64 * _MiB  # assume the smallest (v7x per-TC) VMEM
    if vmem_phys >= 96 * _MiB:
        # v5e / v6e: 128 MiB physical per TensorCore. 10 MiB blocks amortize
        # the ~0.35 us per-step cost to ~2% of the HBM roofline; the explicit
        # 56 MiB scoped limit covers 4x10 MiB of pipeline buffers with headroom
        # (and stays safe even if a 2-TC chip ever reports per-chip VMEM here).
        return 10 * _MiB, 56 * _MiB
    # v7x: 64 MiB physical per TC (32 MiB scoped default). 8 MiB blocks =>
    # 32 MiB of buffers; a 48 MiB limit leaves spill/scratch headroom.
    return 8 * _MiB, 48 * _MiB


def _pick_lane_width(n):
    # Largest multiple of 128 that divides n, up to 2048 lanes: keeps stores as
    # wide unmasked vst streams and minimizes row/step count (covers n%384==0,
    # n%1536==0, ... shapes, not just powers of two).
    for w in range(2048, 127, -128):
        if n % w == 0:
            return w
    return 128


def _choose_block_rows(rows, lane_w, itemsize, block_bytes):
    row_align = max(8, 32 // itemsize)  # sublane pack: 8 f32 / 16 bf16 / 32 i8
    row_bytes = lane_w * itemsize
    total_bytes = rows * row_bytes
    if rows <= row_align or total_bytes < _MIN_GRID_STEPS * _MIN_SPLIT_BLOCK_BYTES:
        # Small input: one full-extent block. Splitting would only add the
        # per-step overhead with no read/compute/write overlap to gain.
        return rows
    target = max(row_align, (block_bytes // row_bytes) // row_align * row_align)
    # Guarantee >= _MIN_GRID_STEPS steps so each v7x TensorCore sees >= 3
    # blocks and its double-buffered pipeline actually overlaps DMA/compute.
    cap = max(row_align, (rows // _MIN_GRID_STEPS) // row_align * row_align)
    return min(target, cap)


def _tiled_add_const(x2d, const_arr, block_rows, vmem_limit_bytes):
    rows, lane_w = x2d.shape
    itemsize = jnp.dtype(x2d.dtype).itemsize
    num_blocks = pl.cdiv(rows, block_rows)
    return pl.pallas_call(
        _plus_const_kernel,
        out_shape=jax.ShapeDtypeStruct((rows, lane_w), x2d.dtype),
        grid_spec=pltpu.PrefetchScalarGridSpec(
            num_scalar_prefetch=0,
            grid=(num_blocks,),
            in_specs=[
                pl.BlockSpec((block_rows, lane_w), lambda i: (i, 0)),
                # Scalar constant in SMEM: no recompile per const value.
                pl.BlockSpec(memory_space=pltpu.MemorySpace.SMEM),
            ],
            out_specs=pl.BlockSpec((block_rows, lane_w), lambda i: (i, 0)),
        ),
        compiler_params=pltpu.CompilerParams(
            dimension_semantics=("parallel",),
            vmem_limit_bytes=vmem_limit_bytes,
        ),
        # Pure streaming op: n flops, 2n bytes of HBM traffic, no EUP work.
        cost_estimate=pl.CostEstimate(
            flops=rows * lane_w,
            transcendentals=0,
            bytes_accessed=2 * rows * lane_w * itemsize,
        ),
        # Elementwise, shape/dtype preserving: reuse the input HBM buffer
        # (input 0 = x2d) for output 0. Paired with donate_argnums at jit so
        # the fast-path bitcast reshape keeps HBM traffic at the 2n-byte floor.
        input_output_aliases={0: 0},
    )(x2d, const_arr)


def plus_const(x: jax.Array, const) -> jax.Array:
    """Pallas TPU implementation of PlusConst.forward: x + const."""
    orig_shape = x.shape
    dtype = x.dtype
    n = x.size
    if n == 0:
        return x

    itemsize = jnp.dtype(dtype).itemsize
    if jnp.issubdtype(dtype, jnp.floating):
        smem_dtype = jnp.float32
    elif jnp.issubdtype(dtype, jnp.integer):
        # TODO(synk): PyTorch would promote int tensor + float scalar to float;
        # here we keep the tensor dtype, so a fractional const truncates.
        smem_dtype = jnp.int32
    else:
        smem_dtype = jnp.float32
    const_arr = jnp.full((1, 1), const, dtype=smem_dtype)

    block_bytes, vmem_limit = _block_budget()

    def run(x2d):
        rows, lane_w = x2d.shape
        block_rows = _choose_block_rows(rows, lane_w, itemsize, block_bytes)
        return _tiled_add_const(x2d, const_arr, block_rows, vmem_limit)

    if n % 128 == 0:
        # Fast path: pure bitcast reshape (no pad, no slice) so the in-place
        # alias can target the caller's HBM buffer directly.
        lane_w = _pick_lane_width(n)
        out2d = run(x.reshape(n // lane_w, lane_w))
        return out2d.reshape(orig_shape)

    # Ragged path: run the streaming kernel on the 128-aligned bulk and a tiny
    # full-extent kernel on the <128-element tail — no whole-array pad + slice
    # (that was ~3x the HBM traffic of the 2n-byte ideal).
    # TODO(synk): the slice/concatenate here still defeats true in-place
    # donation for ragged sizes; a masked final-block store would remove it.
    x_flat = x.reshape(-1)
    bulk = (n // 128) * 128
    pieces = []
    if bulk:
        lane_w = _pick_lane_width(bulk)
        out_bulk = run(x_flat[:bulk].reshape(bulk // lane_w, lane_w))
        pieces.append(out_bulk.reshape(-1))
    tail = n - bulk
    out_tail = run(x_flat[bulk:].reshape(1, tail))
    pieces.append(out_tail.reshape(-1))
    return jnp.concatenate(pieces).reshape(orig_shape)


if __name__ == "__main__":
    key = jax.random.PRNGKey(0)
    # Small NCHW-shaped input, consistent with typical conv-module inputs.
    x = jax.random.normal(key, (2, 4, 16, 16), dtype=jnp.float32)
    const = 3.5  # PlusConst(const=3.5)

    # Reference computed BEFORE x is donated to the kernel.
    ref = x + const

    fn = jax.jit(plus_const, donate_argnums=(0,))
    out = jax.block_until_ready(fn(x, const))

    assert out.shape == ref.shape and out.dtype == ref.dtype
    assert jnp.allclose(out, ref, atol=1e-6, rtol=1e-6)
    print("KERNEL_OK")
</pallas_src>

<mosaic_0001>
module attributes {stable_mosaic.version = 11 : i64} {
  func.func @_plus_const_kernel(%arg0: i32, %arg1: memref<1x2048xf32, #tpu.memory_space<vmem>>, %arg2: memref<1x1xf32, #tpu.memory_space<smem>>, %arg3: memref<1x2048xf32, #tpu.memory_space<vmem>>) attributes {dimension_semantics = [#tpu.dimension_semantics<parallel>], iteration_bounds = array<i64: 1>, scalar_prefetch = 0 : i64, scratch_operands = 0 : i64, tpu.core_type = #tpu.core_type<tc>, window_params = [{transform_indices = @transform_0, window_bounds = array<i64: 1, 2048>}, {transform_indices = @transform_1, window_bounds = array<i64: 1, 1>}, {transform_indices = @transform_2, window_bounds = array<i64: 1, 2048>}]} {
    %c0 = arith.constant 0 : index
    %c0_0 = arith.constant 0 : index
    %0 = memref.load %arg2[%c0, %c0_0] : memref<1x1xf32, #tpu.memory_space<smem>>
    %c0_1 = arith.constant 0 : index
    %c0_2 = arith.constant 0 : index
    %1 = vector.load %arg1[%c0_1, %c0_2] : memref<1x2048xf32, #tpu.memory_space<vmem>>, vector<1x2048xf32>
    %2 = vector.broadcast %0 : f32 to vector<1x2048xf32>
    %3 = arith.addf %1, %2 : vector<1x2048xf32>
    %c0_3 = arith.constant 0 : index
    %c0_4 = arith.constant 0 : index
    %4 = vector.load %arg3[%c0_3, %c0_4] : memref<1x2048xf32, #tpu.memory_space<vmem>>, vector<1x2048xf32>
    tpu.vector_store %arg3[%c0_3, %c0_4], %3 {strides = array<i32>} : memref<1x2048xf32, #tpu.memory_space<vmem>>, vector<1x2048xf32>,
    return
  }
  func.func @transform_0(%arg0: i32) -> (i32, i32) {
    %c0_i32 = arith.constant 0 : i32
    %c0_i32_0 = arith.constant 0 : i32
    return %arg0, %c0_i32 : i32, i32
  }
  func.func @transform_1(%arg0: i32) -> (i32, i32) {
    %c0_i32 = arith.constant 0 : i32
    %c0_i32_0 = arith.constant 0 : i32
    %c0_i32_1 = arith.constant 0 : i32
    return %c0_i32, %c0_i32_0 : i32, i32
  }
  func.func @transform_2(%arg0: i32) -> (i32, i32) {
    %c0_i32 = arith.constant 0 : i32
    %c0_i32_0 = arith.constant 0 : i32
    return %arg0, %c0_i32 : i32, i32
  }
}

</mosaic_0001>

<bundles_post_ra>
// kernel: plus_const.1
= control target key start
LH: loop header
LB: loop body
LE: loop exit
PB: predicated region body
PF: predicated region fallthrough
CT: control target
= control target key end

     0   :  { %s54_s0 = inlined_call_operand.vmem [shape: f32[1,2048], index: 0, kind: input, shape index: {}, may-alias: {0,2}]   ;;  %s55_s1 = inlined_call_operand.<no memory space> [shape: f32[1,1], index: 1, kind: input, shape index: {}]   ;;  %s56_s2 = inlined_call_operand.vmem [shape: f32[1,2048], index: 2, kind: output, shape index: {}, may-alias: {0,2}]  }
   0x1   :  { %v13_v0 = vld [vmem:[%s54_s0] sm:$0xff]  ;;  %v15_v1 = vstv %s55_s1  ;;  %v14_v2 = vld [vmem:[%s54_s0 + $0x8] sm:$0xff] }
   0x2   :  { %v16_v3 = vadd.f32 %v15_v1, %v13_v0  ;;  %v17_v4 = vadd.f32 %v15_v1, %v14_v2 }
   0x4   :  { %18 = vst [vmem:[%s56_s2] sm:$0xff] %v16_v3 }
   0x5   :  { %19 = vst [vmem:[%s56_s2 + $0x8] sm:$0xff] %v17_v4 }

</bundles_post_ra>
